<compile_context>
chip_gen: v7x
topology: tpu7x:2x2x1
jax: 0.10.0
libtpu: 0.0.40
codegen_flags: <defaults>
</compile_context>

<pallas_src>
import functools

import jax
import jax.numpy as jnp
from jax.experimental import pallas as pl
from jax.experimental.pallas import tpu as pltpu


def _sum_over_batch(v):
    """Sum a (N, C, 1) value over the (small, static) batch axis -> (C, 1)."""
    acc = v[0]
    for im in range(1, v.shape[0]):
        acc = acc + v[im]
    return acc


def fused_stdconv_kernel(x_ref, gamma_ref, beta_ref, w_ref, o_ref, slab_ref, *,
                         width, kh, kw, padding, eps):
    n, c_in, hw = x_ref.shape

    x = x_ref[...].astype(jnp.float32)                        # (N, C_in, HW)

    # ---- BatchNorm2d (training-mode batch stats, biased variance) + ReLU ----
    cnt = float(n * hw)
    mean = _sum_over_batch(jnp.sum(x, axis=2, keepdims=True)) / cnt      # (C_in, 1)
    xc = x - mean[None]                                                  # centered
    var = _sum_over_batch(jnp.sum(xc * xc, axis=2, keepdims=True)) / cnt # (C_in, 1)
    inv = jax.lax.rsqrt(var + eps)                                       # (C_in, 1)
    scale = gamma_ref[...] * inv                                         # (C_in, 1)
    y = jnp.maximum(xc * scale[None] + beta_ref[...][None], 0.0)         # (N, C_in, HW)

    # ---- im2col, fully lane-dense (flat spatial on the lane axis) ----
    # Zero-extend the flat image once so every tap is a static lane slice
    # (zeros also implement the conv's top/bottom zero padding).
    maxoff = padding * width + padding
    if maxoff > 0:
        zpad = jnp.zeros((n, c_in, maxoff), jnp.float32)
        y_wide = jnp.concatenate([zpad, y, zpad], axis=2)     # (N, C_in, HW + 2*maxoff)
    else:
        y_wide = y

    # Output-column index of every flat position (for the horizontal-wrap mask).
    ow_idx = jax.lax.broadcasted_iota(jnp.int32, (1, 1, hw), 2) % width

    for i in range(kh):                                       # static unroll over taps
        for j in range(kw):
            dj = j - padding
            off = (i - padding) * width + dj
            shifted = y_wide[:, :, maxoff + off: maxoff + off + hw]
            col_ok = jnp.logical_and(ow_idx + dj >= 0, ow_idx + dj < width)
            tap = jnp.where(col_ok, shifted, 0.0)             # (N, C_in, HW)
            t = i * kw + j
            for im in range(n):                               # lane-dense slab stores
                slab_ref[t * c_in:(t + 1) * c_in, im * hw:(im + 1) * hw] = tap[im]

    # ---- single flipped-orientation MXU matmul (bf16 operands, f32 acc) ----
    rhs = slab_ref[...].astype(jnp.bfloat16)                  # (KH*KW*C_in, N*HW)
    out = jnp.dot(w_ref[...], rhs, preferred_element_type=jnp.float32)   # (C_out, N*HW)
    for im in range(n):                                       # lane-dense output stores
        o_ref[im] = out[:, im * hw:(im + 1) * hw].astype(o_ref.dtype)


@functools.partial(jax.jit, static_argnames=("stride", "padding"))
def std_conv_forward(x_nchw, conv_w_oihw, gamma, beta, *, stride, padding):
    N, C_in, H, W = x_nchw.shape
    C_out, _, KH, KW = conv_w_oihw.shape
    H_out = (H + 2 * padding - KH) // stride + 1
    W_out = (W + 2 * padding - KW) // stride + 1

    if stride != 1 or H_out != H or W_out != W:
        # TODO(synk): general stride / non-"same" padding needs a padded-scratch
        # im2col path (pl.ds(..., stride=stride) ref taps); only the stride-1
        # "same" configuration is implemented as a fused Pallas kernel here.
        raise NotImplementedError("fused StdConv kernel supports stride=1 'same' convs")

    # TODO(synk): for batches that do not fit VMEM, split into a stats pass +
    # a batched conv pass; the whole batch here is a few KB so one step is best.
    x_flat = x_nchw.astype(jnp.float32).reshape(N, C_in, H * W)     # free reshape
    g2 = gamma.astype(jnp.float32).reshape(C_in, 1)
    b2 = beta.astype(jnp.float32).reshape(C_in, 1)
    # OIHW -> (C_out, KH*KW*C_in), rows ordered (kh, kw, ci), bf16 MXU operand.
    w2d = jnp.transpose(conv_w_oihw, (0, 2, 3, 1)).reshape(
        C_out, KH * KW * C_in).astype(jnp.bfloat16)

    cost = pl.CostEstimate(
        flops=2 * C_out * KH * KW * C_in * N * H_out * W_out + 8 * N * C_in * H * W,
        transcendentals=C_in,
        bytes_accessed=N * C_in * H * W * 4
                       + N * C_out * H_out * W_out * 4
                       + C_out * KH * KW * C_in * 2)

    kernel = functools.partial(
        fused_stdconv_kernel, width=W, kh=KH, kw=KW, padding=padding, eps=1e-5)

    out_flat = pl.pallas_call(
        kernel,
        out_shape=jax.ShapeDtypeStruct((N, C_out, H_out * W_out), jnp.float32),
        grid=(1,),
        in_specs=[
            pl.BlockSpec((N, C_in, H * W), lambda i: (0, 0, 0)),
            pl.BlockSpec((C_in, 1), lambda i: (0, 0)),
            pl.BlockSpec((C_in, 1), lambda i: (0, 0)),
            pl.BlockSpec((C_out, KH * KW * C_in), lambda i: (0, 0)),
        ],
        out_specs=pl.BlockSpec((N, C_out, H_out * W_out), lambda i: (0, 0, 0)),
        scratch_shapes=[pltpu.VMEM((KH * KW * C_in, N * H_out * W_out), jnp.float32)],
        compiler_params=pltpu.CompilerParams(dimension_semantics=("arbitrary",)),
        cost_estimate=cost,
    )(x_flat, g2, b2, w2d)

    return out_flat.reshape(N, C_out, H_out, W_out)             # NCHW, free reshape


# Pure-JAX f32 reference (same semantics) for a correctness check.
def _reference(x, w, gamma, beta, stride, padding):
    mean = jnp.mean(x, axis=(0, 2, 3), keepdims=True)
    var = jnp.mean((x - mean) ** 2, axis=(0, 2, 3), keepdims=True)
    xn = (x - mean) * jax.lax.rsqrt(var + 1e-5)
    xn = xn * gamma.reshape(1, -1, 1, 1) + beta.reshape(1, -1, 1, 1)
    xr = jnp.maximum(xn, 0.0)
    return jax.lax.conv_general_dilated(
        xr, w, (stride, stride),
        ((padding, padding), (padding, padding)),
        dimension_numbers=("NCHW", "OIHW", "NCHW"),
    )


if __name__ == "__main__":
    # StdConv(C_in=4, C_out=8, kernel_size=3, stride=1, padding=1)
    C_in, C_out, K, stride, padding = 4, 8, 3, 1, 1
    N, H, W = 2, 16, 16

    key = jax.random.PRNGKey(0)
    kx, kwk, kg, kb = jax.random.split(key, 4)
    x = jax.random.normal(kx, (N, C_in, H, W), jnp.float32)
    conv_w = jax.random.normal(kwk, (C_out, C_in, K, K), jnp.float32) * 0.1
    gamma = 1.0 + 0.1 * jax.random.normal(kg, (C_in,), jnp.float32)
    beta = 0.1 * jax.random.normal(kb, (C_in,), jnp.float32)

    out = std_conv_forward(x, conv_w, gamma, beta, stride=stride, padding=padding)
    out = jax.block_until_ready(out)

    ref = _reference(x, conv_w, gamma, beta, stride, padding)
    assert out.shape == (N, C_out, H, W), out.shape
    # bf16 MXU operands with f32 accumulation vs all-f32 reference: a few e-3
    # absolute error; 3e-2 tolerance documents that budget.
    err = float(jnp.max(jnp.abs(out - ref)))
    assert err < 3e-2, err

    print("KERNEL_OK")
</pallas_src>

<mosaic_0001>
module attributes {stable_mosaic.version = 11 : i64} {
  func.func @fused_stdconv_kernel(%arg0: i32, %arg1: memref<2x4x256xf32, #tpu.memory_space<vmem>>, %arg2: memref<4x1xf32, #tpu.memory_space<vmem>>, %arg3: memref<4x1xf32, #tpu.memory_space<vmem>>, %arg4: memref<8x36xbf16, #tpu.memory_space<vmem>>, %arg5: memref<2x8x256xf32, #tpu.memory_space<vmem>>, %arg6: memref<36x512xf32, #tpu.memory_space<vmem>>) attributes {dimension_semantics = [#tpu.dimension_semantics<arbitrary>], iteration_bounds = array<i64: 1>, scalar_prefetch = 0 : i64, scratch_operands = 1 : i64, tpu.core_type = #tpu.core_type<tc>, window_params = [{pipeline_mode = #tpu.pipeline_mode<synchronous>, transform_indices = @transform_0, window_bounds = array<i64: 2, 4, 256>}, {pipeline_mode = #tpu.pipeline_mode<synchronous>, transform_indices = @transform_1, window_bounds = array<i64: 4, 1>}, {pipeline_mode = #tpu.pipeline_mode<synchronous>, transform_indices = @transform_2, window_bounds = array<i64: 4, 1>}, {pipeline_mode = #tpu.pipeline_mode<synchronous>, transform_indices = @transform_3, window_bounds = array<i64: 8, 36>}, {pipeline_mode = #tpu.pipeline_mode<synchronous>, transform_indices = @transform_4, window_bounds = array<i64: 2, 8, 256>}]} {
    %c0 = arith.constant 0 : index
    %c0_0 = arith.constant 0 : index
    %c0_1 = arith.constant 0 : index
    %0 = vector.load %arg1[%c0, %c0_0, %c0_1] : memref<2x4x256xf32, #tpu.memory_space<vmem>>, vector<2x4x256xf32>
    %cst = arith.constant dense<0.000000e+00> : vector<2x4xf32>
    %1 = vector.multi_reduction <add>, %0, %cst [2] : vector<2x4x256xf32> to vector<2x4xf32>
    %2 = vector.shape_cast %1 : vector<2x4xf32> to vector<2x4x1xf32>
    %3 = vector.extract_strided_slice %2 {offsets = [0, 0, 0], sizes = [1, 4, 1], strides = [1, 1, 1]} : vector<2x4x1xf32> to vector<1x4x1xf32>
    %4 = vector.shape_cast %3 : vector<1x4x1xf32> to vector<4x1xf32>
    %5 = vector.extract_strided_slice %2 {offsets = [1, 0, 0], sizes = [1, 4, 1], strides = [1, 1, 1]} : vector<2x4x1xf32> to vector<1x4x1xf32>
    %6 = vector.shape_cast %5 : vector<1x4x1xf32> to vector<4x1xf32>
    %7 = arith.addf %4, %6 : vector<4x1xf32>
    %cst_2 = arith.constant 5.120000e+02 : f32
    %8 = vector.broadcast %cst_2 : f32 to vector<4x1xf32>
    %9 = arith.divf %7, %8 : vector<4x1xf32>
    %10 = vector.shape_cast %9 : vector<4x1xf32> to vector<1x4x1xf32>
    %11 = vector.broadcast %10 : vector<1x4x1xf32> to vector<2x4x256xf32>
    %12 = arith.subf %0, %11 : vector<2x4x256xf32>
    %13 = arith.mulf %12, %12 : vector<2x4x256xf32>
    %cst_3 = arith.constant dense<0.000000e+00> : vector<2x4xf32>
    %14 = vector.multi_reduction <add>, %13, %cst_3 [2] : vector<2x4x256xf32> to vector<2x4xf32>
    %15 = vector.shape_cast %14 : vector<2x4xf32> to vector<2x4x1xf32>
    %16 = vector.extract_strided_slice %15 {offsets = [0, 0, 0], sizes = [1, 4, 1], strides = [1, 1, 1]} : vector<2x4x1xf32> to vector<1x4x1xf32>
    %17 = vector.shape_cast %16 : vector<1x4x1xf32> to vector<4x1xf32>
    %18 = vector.extract_strided_slice %15 {offsets = [1, 0, 0], sizes = [1, 4, 1], strides = [1, 1, 1]} : vector<2x4x1xf32> to vector<1x4x1xf32>
    %19 = vector.shape_cast %18 : vector<1x4x1xf32> to vector<4x1xf32>
    %20 = arith.addf %17, %19 : vector<4x1xf32>
    %cst_4 = arith.constant 5.120000e+02 : f32
    %21 = vector.broadcast %cst_4 : f32 to vector<4x1xf32>
    %22 = arith.divf %20, %21 : vector<4x1xf32>
    %cst_5 = arith.constant 9.99999974E-6 : f32
    %23 = vector.broadcast %cst_5 : f32 to vector<4x1xf32>
    %24 = arith.addf %22, %23 : vector<4x1xf32>
    %25 = math.rsqrt %24 : vector<4x1xf32>
    %c0_6 = arith.constant 0 : index
    %c0_7 = arith.constant 0 : index
    %26 = vector.load %arg2[%c0_6, %c0_7] : memref<4x1xf32, #tpu.memory_space<vmem>>, vector<4x1xf32>
    %27 = arith.mulf %26, %25 : vector<4x1xf32>
    %28 = vector.shape_cast %27 : vector<4x1xf32> to vector<1x4x1xf32>
    %29 = vector.broadcast %28 : vector<1x4x1xf32> to vector<2x4x256xf32>
    %30 = arith.mulf %12, %29 : vector<2x4x256xf32>
    %c0_8 = arith.constant 0 : index
    %c0_9 = arith.constant 0 : index
    %31 = vector.load %arg3[%c0_8, %c0_9] : memref<4x1xf32, #tpu.memory_space<vmem>>, vector<4x1xf32>
    %32 = vector.shape_cast %31 : vector<4x1xf32> to vector<1x4x1xf32>
    %33 = vector.broadcast %32 : vector<1x4x1xf32> to vector<2x4x256xf32>
    %34 = arith.addf %30, %33 : vector<2x4x256xf32>
    %cst_10 = arith.constant 0.000000e+00 : f32
    %35 = vector.broadcast %cst_10 : f32 to vector<2x4x256xf32>
    %36 = arith.maximumf %34, %35 : vector<2x4x256xf32>
    %cst_11 = arith.constant 0.000000e+00 : f32
    %37 = vector.broadcast %cst_11 : f32 to vector<2x4x17xf32>
    %38 = tpu.concatenate %37, %36, %37 in 2 : vector<2x4x17xf32>, vector<2x4x256xf32>, vector<2x4x17xf32> -> vector<2x4x290xf32>
    %39 = tpu.iota {dimensions = array<i32: 2>} : vector<1x1x256xi32>
    %c16_i32 = arith.constant 16 : i32
    %c0_i32 = arith.constant 0 : i32
    %40 = arith.cmpi eq, %c16_i32, %c0_i32 : i32
    %c1_i32 = arith.constant 1 : i32
    %41 = arith.select %40, %c1_i32, %c16_i32 : i32
    %42 = vector.broadcast %41 : i32 to vector<1x1x256xi32>
    %43 = arith.remsi %39, %42 : vector<1x1x256xi32>
    %c0_i32_12 = arith.constant 0 : i32
    %44 = vector.broadcast %c0_i32_12 : i32 to vector<1x1x256xi32>
    %45 = arith.cmpi ne, %43, %44 : vector<1x1x256xi32>
    %c0_i32_13 = arith.constant 0 : i32
    %46 = vector.broadcast %c0_i32_13 : i32 to vector<1x1x256xi32>
    %47 = arith.cmpi slt, %43, %46 : vector<1x1x256xi32>
    %c0_i32_14 = arith.constant 0 : i32
    %48 = arith.cmpi slt, %41, %c0_i32_14 : i32
    %49 = vector.broadcast %48 : i1 to vector<1x1x256xi1>
    %50 = vector.broadcast %49 : vector<1x1x256xi1> to vector<1x1x256xi1>
    %51 = arith.xori %47, %50 : vector<1x1x256xi1>
    %52 = arith.andi %51, %45 : vector<1x1x256xi1>
    %53 = vector.broadcast %41 : i32 to vector<1x1x256xi32>
    %54 = arith.addi %43, %53 : vector<1x1x256xi32>
    %55 = arith.select %52, %54, %43 : vector<1x1x256xi1>, vector<1x1x256xi32>
    %56 = vector.extract_strided_slice %38 {offsets = [0, 0, 0], sizes = [2, 4, 256], strides = [1, 1, 1]} : vector<2x4x290xf32> to vector<2x4x256xf32>
    %c-1_i32 = arith.constant -1 : i32
    %57 = vector.broadcast %c-1_i32 : i32 to vector<1x1x256xi32>
    %58 = arith.addi %55, %57 : vector<1x1x256xi32>
    %c0_i32_15 = arith.constant 0 : i32
    %59 = vector.broadcast %c0_i32_15 : i32 to vector<1x1x256xi32>
    %60 = arith.cmpi sge, %58, %59 : vector<1x1x256xi32>
    %c-1_i32_16 = arith.constant -1 : i32
    %61 = vector.broadcast %c-1_i32_16 : i32 to vector<1x1x256xi32>
    %62 = arith.addi %55, %61 : vector<1x1x256xi32>
    %c16_i32_17 = arith.constant 16 : i32
    %63 = vector.broadcast %c16_i32_17 : i32 to vector<1x1x256xi32>
    %64 = arith.cmpi slt, %62, %63 : vector<1x1x256xi32>
    %65 = arith.andi %60, %64 : vector<1x1x256xi1>
    %cst_18 = arith.constant 0.000000e+00 : f32
    %66 = vector.shape_cast %65 : vector<1x1x256xi1> to vector<1x1x256xi1>
    %67 = vector.broadcast %66 : vector<1x1x256xi1> to vector<2x4x256xi1>
    %68 = vector.broadcast %cst_18 : f32 to vector<2x4x256xf32>
    %69 = arith.select %67, %56, %68 : vector<2x4x256xi1>, vector<2x4x256xf32>
    %70 = vector.extract_strided_slice %69 {offsets = [0, 0, 0], sizes = [1, 4, 256], strides = [1, 1, 1]} : vector<2x4x256xf32> to vector<1x4x256xf32>
    %71 = vector.shape_cast %70 : vector<1x4x256xf32> to vector<4x256xf32>
    %c0_19 = arith.constant 0 : index
    %c0_20 = arith.constant 0 : index
    %72 = vector.load %arg6[%c0_19, %c0_20] : memref<36x512xf32, #tpu.memory_space<vmem>>, vector<4x256xf32>
    tpu.vector_store %arg6[%c0_19, %c0_20], %71 {strides = array<i32>} : memref<36x512xf32, #tpu.memory_space<vmem>>, vector<4x256xf32>,
    %73 = vector.extract_strided_slice %69 {offsets = [1, 0, 0], sizes = [1, 4, 256], strides = [1, 1, 1]} : vector<2x4x256xf32> to vector<1x4x256xf32>
    %74 = vector.shape_cast %73 : vector<1x4x256xf32> to vector<4x256xf32>
    %c0_21 = arith.constant 0 : index
    %c256 = arith.constant 256 : index
    %75 = vector.load %arg6[%c0_21, %c256] : memref<36x512xf32, #tpu.memory_space<vmem>>, vector<4x256xf32>
    tpu.vector_store %arg6[%c0_21, %c256], %74 {strides = array<i32>} : memref<36x512xf32, #tpu.memory_space<vmem>>, vector<4x256xf32>,
    %76 = vector.extract_strided_slice %38 {offsets = [0, 0, 1], sizes = [2, 4, 256], strides = [1, 1, 1]} : vector<2x4x290xf32> to vector<2x4x256xf32>
    %c0_i32_22 = arith.constant 0 : i32
    %77 = vector.broadcast %c0_i32_22 : i32 to vector<1x1x256xi32>
    %78 = arith.addi %55, %77 : vector<1x1x256xi32>
    %c0_i32_23 = arith.constant 0 : i32
    %79 = vector.broadcast %c0_i32_23 : i32 to vector<1x1x256xi32>
    %80 = arith.cmpi sge, %78, %79 : vector<1x1x256xi32>
    %c0_i32_24 = arith.constant 0 : i32
    %81 = vector.broadcast %c0_i32_24 : i32 to vector<1x1x256xi32>
    %82 = arith.addi %55, %81 : vector<1x1x256xi32>
    %c16_i32_25 = arith.constant 16 : i32
    %83 = vector.broadcast %c16_i32_25 : i32 to vector<1x1x256xi32>
    %84 = arith.cmpi slt, %82, %83 : vector<1x1x256xi32>
    %85 = arith.andi %80, %84 : vector<1x1x256xi1>
    %cst_26 = arith.constant 0.000000e+00 : f32
    %86 = vector.shape_cast %85 : vector<1x1x256xi1> to vector<1x1x256xi1>
    %87 = vector.broadcast %86 : vector<1x1x256xi1> to vector<2x4x256xi1>
    %88 = vector.broadcast %cst_26 : f32 to vector<2x4x256xf32>
    %89 = arith.select %87, %76, %88 : vector<2x4x256xi1>, vector<2x4x256xf32>
    %90 = vector.extract_strided_slice %89 {offsets = [0, 0, 0], sizes = [1, 4, 256], strides = [1, 1, 1]} : vector<2x4x256xf32> to vector<1x4x256xf32>
    %91 = vector.shape_cast %90 : vector<1x4x256xf32> to vector<4x256xf32>
    %c4 = arith.constant 4 : index
    %c0_27 = arith.constant 0 : index
    %92 = vector.load %arg6[%c4, %c0_27] : memref<36x512xf32, #tpu.memory_space<vmem>>, vector<4x256xf32>
    tpu.vector_store %arg6[%c4, %c0_27], %91 {strides = array<i32>} : memref<36x512xf32, #tpu.memory_space<vmem>>, vector<4x256xf32>,
    %93 = vector.extract_strided_slice %89 {offsets = [1, 0, 0], sizes = [1, 4, 256], strides = [1, 1, 1]} : vector<2x4x256xf32> to vector<1x4x256xf32>
    %94 = vector.shape_cast %93 : vector<1x4x256xf32> to vector<4x256xf32>
    %c4_28 = arith.constant 4 : index
    %c256_29 = arith.constant 256 : index
    %95 = vector.load %arg6[%c4_28, %c256_29] : memref<36x512xf32, #tpu.memory_space<vmem>>, vector<4x256xf32>
    tpu.vector_store %arg6[%c4_28, %c256_29], %94 {strides = array<i32>} : memref<36x512xf32, #tpu.memory_space<vmem>>, vector<4x256xf32>,
    %96 = vector.extract_strided_slice %38 {offsets = [0, 0, 2], sizes = [2, 4, 256], strides = [1, 1, 1]} : vector<2x4x290xf32> to vector<2x4x256xf32>
    %c1_i32_30 = arith.constant 1 : i32
    %97 = vector.broadcast %c1_i32_30 : i32 to vector<1x1x256xi32>
    %98 = arith.addi %55, %97 : vector<1x1x256xi32>
    %c0_i32_31 = arith.constant 0 : i32
    %99 = vector.broadcast %c0_i32_31 : i32 to vector<1x1x256xi32>
    %100 = arith.cmpi sge, %98, %99 : vector<1x1x256xi32>
    %c1_i32_32 = arith.constant 1 : i32
    %101 = vector.broadcast %c1_i32_32 : i32 to vector<1x1x256xi32>
    %102 = arith.addi %55, %101 : vector<1x1x256xi32>
    %c16_i32_33 = arith.constant 16 : i32
    %103 = vector.broadcast %c16_i32_33 : i32 to vector<1x1x256xi32>
    %104 = arith.cmpi slt, %102, %103 : vector<1x1x256xi32>
    %105 = arith.andi %100, %104 : vector<1x1x256xi1>
    %cst_34 = arith.constant 0.000000e+00 : f32
    %106 = vector.shape_cast %105 : vector<1x1x256xi1> to vector<1x1x256xi1>
    %107 = vector.broadcast %106 : vector<1x1x256xi1> to vector<2x4x256xi1>
    %108 = vector.broadcast %cst_34 : f32 to vector<2x4x256xf32>
    %109 = arith.select %107, %96, %108 : vector<2x4x256xi1>, vector<2x4x256xf32>
    %110 = vector.extract_strided_slice %109 {offsets = [0, 0, 0], sizes = [1, 4, 256], strides = [1, 1, 1]} : vector<2x4x256xf32> to vector<1x4x256xf32>
    %111 = vector.shape_cast %110 : vector<1x4x256xf32> to vector<4x256xf32>
    %c8 = arith.constant 8 : index
    %c0_35 = arith.constant 0 : index
    %112 = vector.load %arg6[%c8, %c0_35] : memref<36x512xf32, #tpu.memory_space<vmem>>, vector<4x256xf32>
    tpu.vector_store %arg6[%c8, %c0_35], %111 {strides = array<i32>} : memref<36x512xf32, #tpu.memory_space<vmem>>, vector<4x256xf32>,
    %113 = vector.extract_strided_slice %109 {offsets = [1, 0, 0], sizes = [1, 4, 256], strides = [1, 1, 1]} : vector<2x4x256xf32> to vector<1x4x256xf32>
    %114 = vector.shape_cast %113 : vector<1x4x256xf32> to vector<4x256xf32>
    %c8_36 = arith.constant 8 : index
    %c256_37 = arith.constant 256 : index
    %115 = vector.load %arg6[%c8_36, %c256_37] : memref<36x512xf32, #tpu.memory_space<vmem>>, vector<4x256xf32>
    tpu.vector_store %arg6[%c8_36, %c256_37], %114 {strides = array<i32>} : memref<36x512xf32, #tpu.memory_space<vmem>>, vector<4x256xf32>,
    %116 = vector.extract_strided_slice %38 {offsets = [0, 0, 16], sizes = [2, 4, 256], strides = [1, 1, 1]} : vector<2x4x290xf32> to vector<2x4x256xf32>
    %c-1_i32_38 = arith.constant -1 : i32
    %117 = vector.broadcast %c-1_i32_38 : i32 to vector<1x1x256xi32>
    %118 = arith.addi %55, %117 : vector<1x1x256xi32>
    %c0_i32_39 = arith.constant 0 : i32
    %119 = vector.broadcast %c0_i32_39 : i32 to vector<1x1x256xi32>
    %120 = arith.cmpi sge, %118, %119 : vector<1x1x256xi32>
    %c-1_i32_40 = arith.constant -1 : i32
    %121 = vector.broadcast %c-1_i32_40 : i32 to vector<1x1x256xi32>
    %122 = arith.addi %55, %121 : vector<1x1x256xi32>
    %c16_i32_41 = arith.constant 16 : i32
    %123 = vector.broadcast %c16_i32_41 : i32 to vector<1x1x256xi32>
    %124 = arith.cmpi slt, %122, %123 : vector<1x1x256xi32>
    %125 = arith.andi %120, %124 : vector<1x1x256xi1>
    %cst_42 = arith.constant 0.000000e+00 : f32
    %126 = vector.shape_cast %125 : vector<1x1x256xi1> to vector<1x1x256xi1>
    %127 = vector.broadcast %126 : vector<1x1x256xi1> to vector<2x4x256xi1>
    %128 = vector.broadcast %cst_42 : f32 to vector<2x4x256xf32>
    %129 = arith.select %127, %116, %128 : vector<2x4x256xi1>, vector<2x4x256xf32>
    %130 = vector.extract_strided_slice %129 {offsets = [0, 0, 0], sizes = [1, 4, 256], strides = [1, 1, 1]} : vector<2x4x256xf32> to vector<1x4x256xf32>
    %131 = vector.shape_cast %130 : vector<1x4x256xf32> to vector<4x256xf32>
    %c12 = arith.constant 12 : index
    %c0_43 = arith.constant 0 : index
    %132 = vector.load %arg6[%c12, %c0_43] : memref<36x512xf32, #tpu.memory_space<vmem>>, vector<4x256xf32>
    tpu.vector_store %arg6[%c12, %c0_43], %131 {strides = array<i32>} : memref<36x512xf32, #tpu.memory_space<vmem>>, vector<4x256xf32>,
    %133 = vector.extract_strided_slice %129 {offsets = [1, 0, 0], sizes = [1, 4, 256], strides = [1, 1, 1]} : vector<2x4x256xf32> to vector<1x4x256xf32>
    %134 = vector.shape_cast %133 : vector<1x4x256xf32> to vector<4x256xf32>
    %c12_44 = arith.constant 12 : index
    %c256_45 = arith.constant 256 : index
    %135 = vector.load %arg6[%c12_44, %c256_45] : memref<36x512xf32, #tpu.memory_space<vmem>>, vector<4x256xf32>
    tpu.vector_store %arg6[%c12_44, %c256_45], %134 {strides = array<i32>} : memref<36x512xf32, #tpu.memory_space<vmem>>, vector<4x256xf32>,
    %136 = vector.extract_strided_slice %38 {offsets = [0, 0, 17], sizes = [2, 4, 256], strides = [1, 1, 1]} : vector<2x4x290xf32> to vector<2x4x256xf32>
    %c0_i32_46 = arith.constant 0 : i32
    %137 = vector.broadcast %c0_i32_46 : i32 to vector<1x1x256xi32>
    %138 = arith.addi %55, %137 : vector<1x1x256xi32>
    %c0_i32_47 = arith.constant 0 : i32
    %139 = vector.broadcast %c0_i32_47 : i32 to vector<1x1x256xi32>
    %140 = arith.cmpi sge, %138, %139 : vector<1x1x256xi32>
    %c0_i32_48 = arith.constant 0 : i32
    %141 = vector.broadcast %c0_i32_48 : i32 to vector<1x1x256xi32>
    %142 = arith.addi %55, %141 : vector<1x1x256xi32>
    %c16_i32_49 = arith.constant 16 : i32
    %143 = vector.broadcast %c16_i32_49 : i32 to vector<1x1x256xi32>
    %144 = arith.cmpi slt, %142, %143 : vector<1x1x256xi32>
    %145 = arith.andi %140, %144 : vector<1x1x256xi1>
    %cst_50 = arith.constant 0.000000e+00 : f32
    %146 = vector.shape_cast %145 : vector<1x1x256xi1> to vector<1x1x256xi1>
    %147 = vector.broadcast %146 : vector<1x1x256xi1> to vector<2x4x256xi1>
    %148 = vector.broadcast %cst_50 : f32 to vector<2x4x256xf32>
    %149 = arith.select %147, %136, %148 : vector<2x4x256xi1>, vector<2x4x256xf32>
    %150 = vector.extract_strided_slice %149 {offsets = [0, 0, 0], sizes = [1, 4, 256], strides = [1, 1, 1]} : vector<2x4x256xf32> to vector<1x4x256xf32>
    %151 = vector.shape_cast %150 : vector<1x4x256xf32> to vector<4x256xf32>
    %c16 = arith.constant 16 : index
    %c0_51 = arith.constant 0 : index
    %152 = vector.load %arg6[%c16, %c0_51] : memref<36x512xf32, #tpu.memory_space<vmem>>, vector<4x256xf32>
    tpu.vector_store %arg6[%c16, %c0_51], %151 {strides = array<i32>} : memref<36x512xf32, #tpu.memory_space<vmem>>, vector<4x256xf32>,
    %153 = vector.extract_strided_slice %149 {offsets = [1, 0, 0], sizes = [1, 4, 256], strides = [1, 1, 1]} : vector<2x4x256xf32> to vector<1x4x256xf32>
    %154 = vector.shape_cast %153 : vector<1x4x256xf32> to vector<4x256xf32>
    %c16_52 = arith.constant 16 : index
    %c256_53 = arith.constant 256 : index
    %155 = vector.load %arg6[%c16_52, %c256_53] : memref<36x512xf32, #tpu.memory_space<vmem>>, vector<4x256xf32>
    tpu.vector_store %arg6[%c16_52, %c256_53], %154 {strides = array<i32>} : memref<36x512xf32, #tpu.memory_space<vmem>>, vector<4x256xf32>,
    %156 = vector.extract_strided_slice %38 {offsets = [0, 0, 18], sizes = [2, 4, 256], strides = [1, 1, 1]} : vector<2x4x290xf32> to vector<2x4x256xf32>
    %c1_i32_54 = arith.constant 1 : i32
    %157 = vector.broadcast %c1_i32_54 : i32 to vector<1x1x256xi32>
    %158 = arith.addi %55, %157 : vector<1x1x256xi32>
    %c0_i32_55 = arith.constant 0 : i32
    %159 = vector.broadcast %c0_i32_55 : i32 to vector<1x1x256xi32>
    %160 = arith.cmpi sge, %158, %159 : vector<1x1x256xi32>
    %c1_i32_56 = arith.constant 1 : i32
    %161 = vector.broadcast %c1_i32_56 : i32 to vector<1x1x256xi32>
    %162 = arith.addi %55, %161 : vector<1x1x256xi32>
    %c16_i32_57 = arith.constant 16 : i32
    %163 = vector.broadcast %c16_i32_57 : i32 to vector<1x1x256xi32>
    %164 = arith.cmpi slt, %162, %163 : vector<1x1x256xi32>
    %165 = arith.andi %160, %164 : vector<1x1x256xi1>
    %cst_58 = arith.constant 0.000000e+00 : f32
    %166 = vector.shape_cast %165 : vector<1x1x256xi1> to vector<1x1x256xi1>
    %167 = vector.broadcast %166 : vector<1x1x256xi1> to vector<2x4x256xi1>
    %168 = vector.broadcast %cst_58 : f32 to vector<2x4x256xf32>
    %169 = arith.select %167, %156, %168 : vector<2x4x256xi1>, vector<2x4x256xf32>
    %170 = vector.extract_strided_slice %169 {offsets = [0, 0, 0], sizes = [1, 4, 256], strides = [1, 1, 1]} : vector<2x4x256xf32> to vector<1x4x256xf32>
    %171 = vector.shape_cast %170 : vector<1x4x256xf32> to vector<4x256xf32>
    %c20 = arith.constant 20 : index
    %c0_59 = arith.constant 0 : index
    %172 = vector.load %arg6[%c20, %c0_59] : memref<36x512xf32, #tpu.memory_space<vmem>>, vector<4x256xf32>
    tpu.vector_store %arg6[%c20, %c0_59], %171 {strides = array<i32>} : memref<36x512xf32, #tpu.memory_space<vmem>>, vector<4x256xf32>,
    %173 = vector.extract_strided_slice %169 {offsets = [1, 0, 0], sizes = [1, 4, 256], strides = [1, 1, 1]} : vector<2x4x256xf32> to vector<1x4x256xf32>
    %174 = vector.shape_cast %173 : vector<1x4x256xf32> to vector<4x256xf32>
    %c20_60 = arith.constant 20 : index
    %c256_61 = arith.constant 256 : index
    %175 = vector.load %arg6[%c20_60, %c256_61] : memref<36x512xf32, #tpu.memory_space<vmem>>, vector<4x256xf32>
    tpu.vector_store %arg6[%c20_60, %c256_61], %174 {strides = array<i32>} : memref<36x512xf32, #tpu.memory_space<vmem>>, vector<4x256xf32>,
    %176 = vector.extract_strided_slice %38 {offsets = [0, 0, 32], sizes = [2, 4, 256], strides = [1, 1, 1]} : vector<2x4x290xf32> to vector<2x4x256xf32>
    %c-1_i32_62 = arith.constant -1 : i32
    %177 = vector.broadcast %c-1_i32_62 : i32 to vector<1x1x256xi32>
    %178 = arith.addi %55, %177 : vector<1x1x256xi32>
    %c0_i32_63 = arith.constant 0 : i32
    %179 = vector.broadcast %c0_i32_63 : i32 to vector<1x1x256xi32>
    %180 = arith.cmpi sge, %178, %179 : vector<1x1x256xi32>
    %c-1_i32_64 = arith.constant -1 : i32
    %181 = vector.broadcast %c-1_i32_64 : i32 to vector<1x1x256xi32>
    %182 = arith.addi %55, %181 : vector<1x1x256xi32>
    %c16_i32_65 = arith.constant 16 : i32
    %183 = vector.broadcast %c16_i32_65 : i32 to vector<1x1x256xi32>
    %184 = arith.cmpi slt, %182, %183 : vector<1x1x256xi32>
    %185 = arith.andi %180, %184 : vector<1x1x256xi1>
    %cst_66 = arith.constant 0.000000e+00 : f32
    %186 = vector.shape_cast %185 : vector<1x1x256xi1> to vector<1x1x256xi1>
    %187 = vector.broadcast %186 : vector<1x1x256xi1> to vector<2x4x256xi1>
    %188 = vector.broadcast %cst_66 : f32 to vector<2x4x256xf32>
    %189 = arith.select %187, %176, %188 : vector<2x4x256xi1>, vector<2x4x256xf32>
    %190 = vector.extract_strided_slice %189 {offsets = [0, 0, 0], sizes = [1, 4, 256], strides = [1, 1, 1]} : vector<2x4x256xf32> to vector<1x4x256xf32>
    %191 = vector.shape_cast %190 : vector<1x4x256xf32> to vector<4x256xf32>
    %c24 = arith.constant 24 : index
    %c0_67 = arith.constant 0 : index
    %192 = vector.load %arg6[%c24, %c0_67] : memref<36x512xf32, #tpu.memory_space<vmem>>, vector<4x256xf32>
    tpu.vector_store %arg6[%c24, %c0_67], %191 {strides = array<i32>} : memref<36x512xf32, #tpu.memory_space<vmem>>, vector<4x256xf32>,
    %193 = vector.extract_strided_slice %189 {offsets = [1, 0, 0], sizes = [1, 4, 256], strides = [1, 1, 1]} : vector<2x4x256xf32> to vector<1x4x256xf32>
    %194 = vector.shape_cast %193 : vector<1x4x256xf32> to vector<4x256xf32>
    %c24_68 = arith.constant 24 : index
    %c256_69 = arith.constant 256 : index
    %195 = vector.load %arg6[%c24_68, %c256_69] : memref<36x512xf32, #tpu.memory_space<vmem>>, vector<4x256xf32>
    tpu.vector_store %arg6[%c24_68, %c256_69], %194 {strides = array<i32>} : memref<36x512xf32, #tpu.memory_space<vmem>>, vector<4x256xf32>,
    %196 = vector.extract_strided_slice %38 {offsets = [0, 0, 33], sizes = [2, 4, 256], strides = [1, 1, 1]} : vector<2x4x290xf32> to vector<2x4x256xf32>
    %c0_i32_70 = arith.constant 0 : i32
    %197 = vector.broadcast %c0_i32_70 : i32 to vector<1x1x256xi32>
    %198 = arith.addi %55, %197 : vector<1x1x256xi32>
    %c0_i32_71 = arith.constant 0 : i32
    %199 = vector.broadcast %c0_i32_71 : i32 to vector<1x1x256xi32>
    %200 = arith.cmpi sge, %198, %199 : vector<1x1x256xi32>
    %c0_i32_72 = arith.constant 0 : i32
    %201 = vector.broadcast %c0_i32_72 : i32 to vector<1x1x256xi32>
    %202 = arith.addi %55, %201 : vector<1x1x256xi32>
    %c16_i32_73 = arith.constant 16 : i32
    %203 = vector.broadcast %c16_i32_73 : i32 to vector<1x1x256xi32>
    %204 = arith.cmpi slt, %202, %203 : vector<1x1x256xi32>
    %205 = arith.andi %200, %204 : vector<1x1x256xi1>
    %cst_74 = arith.constant 0.000000e+00 : f32
    %206 = vector.shape_cast %205 : vector<1x1x256xi1> to vector<1x1x256xi1>
    %207 = vector.broadcast %206 : vector<1x1x256xi1> to vector<2x4x256xi1>
    %208 = vector.broadcast %cst_74 : f32 to vector<2x4x256xf32>
    %209 = arith.select %207, %196, %208 : vector<2x4x256xi1>, vector<2x4x256xf32>
    %210 = vector.extract_strided_slice %209 {offsets = [0, 0, 0], sizes = [1, 4, 256], strides = [1, 1, 1]} : vector<2x4x256xf32> to vector<1x4x256xf32>
    %211 = vector.shape_cast %210 : vector<1x4x256xf32> to vector<4x256xf32>
    %c28 = arith.constant 28 : index
    %c0_75 = arith.constant 0 : index
    %212 = vector.load %arg6[%c28, %c0_75] : memref<36x512xf32, #tpu.memory_space<vmem>>, vector<4x256xf32>
    tpu.vector_store %arg6[%c28, %c0_75], %211 {strides = array<i32>} : memref<36x512xf32, #tpu.memory_space<vmem>>, vector<4x256xf32>,
    %213 = vector.extract_strided_slice %209 {offsets = [1, 0, 0], sizes = [1, 4, 256], strides = [1, 1, 1]} : vector<2x4x256xf32> to vector<1x4x256xf32>
    %214 = vector.shape_cast %213 : vector<1x4x256xf32> to vector<4x256xf32>
    %c28_76 = arith.constant 28 : index
    %c256_77 = arith.constant 256 : index
    %215 = vector.load %arg6[%c28_76, %c256_77] : memref<36x512xf32, #tpu.memory_space<vmem>>, vector<4x256xf32>
    tpu.vector_store %arg6[%c28_76, %c256_77], %214 {strides = array<i32>} : memref<36x512xf32, #tpu.memory_space<vmem>>, vector<4x256xf32>,
    %216 = vector.extract_strided_slice %38 {offsets = [0, 0, 34], sizes = [2, 4, 256], strides = [1, 1, 1]} : vector<2x4x290xf32> to vector<2x4x256xf32>
    %c1_i32_78 = arith.constant 1 : i32
    %217 = vector.broadcast %c1_i32_78 : i32 to vector<1x1x256xi32>
    %218 = arith.addi %55, %217 : vector<1x1x256xi32>
    %c0_i32_79 = arith.constant 0 : i32
    %219 = vector.broadcast %c0_i32_79 : i32 to vector<1x1x256xi32>
    %220 = arith.cmpi sge, %218, %219 : vector<1x1x256xi32>
    %c1_i32_80 = arith.constant 1 : i32
    %221 = vector.broadcast %c1_i32_80 : i32 to vector<1x1x256xi32>
    %222 = arith.addi %55, %221 : vector<1x1x256xi32>
    %c16_i32_81 = arith.constant 16 : i32
    %223 = vector.broadcast %c16_i32_81 : i32 to vector<1x1x256xi32>
    %224 = arith.cmpi slt, %222, %223 : vector<1x1x256xi32>
    %225 = arith.andi %220, %224 : vector<1x1x256xi1>
    %cst_82 = arith.constant 0.000000e+00 : f32
    %226 = vector.shape_cast %225 : vector<1x1x256xi1> to vector<1x1x256xi1>
    %227 = vector.broadcast %226 : vector<1x1x256xi1> to vector<2x4x256xi1>
    %228 = vector.broadcast %cst_82 : f32 to vector<2x4x256xf32>
    %229 = arith.select %227, %216, %228 : vector<2x4x256xi1>, vector<2x4x256xf32>
    %230 = vector.extract_strided_slice %229 {offsets = [0, 0, 0], sizes = [1, 4, 256], strides = [1, 1, 1]} : vector<2x4x256xf32> to vector<1x4x256xf32>
    %231 = vector.shape_cast %230 : vector<1x4x256xf32> to vector<4x256xf32>
    %c32 = arith.constant 32 : index
    %c0_83 = arith.constant 0 : index
    %232 = vector.load %arg6[%c32, %c0_83] : memref<36x512xf32, #tpu.memory_space<vmem>>, vector<4x256xf32>
    tpu.vector_store %arg6[%c32, %c0_83], %231 {strides = array<i32>} : memref<36x512xf32, #tpu.memory_space<vmem>>, vector<4x256xf32>,
    %233 = vector.extract_strided_slice %229 {offsets = [1, 0, 0], sizes = [1, 4, 256], strides = [1, 1, 1]} : vector<2x4x256xf32> to vector<1x4x256xf32>
    %234 = vector.shape_cast %233 : vector<1x4x256xf32> to vector<4x256xf32>
    %c32_84 = arith.constant 32 : index
    %c256_85 = arith.constant 256 : index
    %235 = vector.load %arg6[%c32_84, %c256_85] : memref<36x512xf32, #tpu.memory_space<vmem>>, vector<4x256xf32>
    tpu.vector_store %arg6[%c32_84, %c256_85], %234 {strides = array<i32>} : memref<36x512xf32, #tpu.memory_space<vmem>>, vector<4x256xf32>,
    %c0_86 = arith.constant 0 : index
    %c0_87 = arith.constant 0 : index
    %236 = vector.load %arg6[%c0_86, %c0_87] : memref<36x512xf32, #tpu.memory_space<vmem>>, vector<36x512xf32>
    %237 = arith.truncf %236 : vector<36x512xf32> to vector<36x512xbf16>
    %c0_88 = arith.constant 0 : index
    %c0_89 = arith.constant 0 : index
    %238 = vector.load %arg4[%c0_88, %c0_89] : memref<8x36xbf16, #tpu.memory_space<vmem>>, vector<8x36xbf16>
    %cst_90 = arith.constant dense<0.000000e+00> : vector<8x512xf32>
    %239 = tpu.matmul %238, %237, %cst_90 {dimension_numbers = #tpu.dot_dimension_numbers<[1], [0], [0], [1], [0, 0, 1, 1], [], []>} : vector<8x36xbf16>, vector<36x512xbf16>, vector<8x512xf32> -> vector<8x512xf32>
    %240 = vector.extract_strided_slice %239 {offsets = [0, 0], sizes = [8, 256], strides = [1, 1]} : vector<8x512xf32> to vector<8x256xf32>
    %c0_91 = arith.constant 0 : index
    %c0_92 = arith.constant 0 : index
    %c0_93 = arith.constant 0 : index
    %241 = vector.load %arg5[%c0_91, %c0_92, %c0_93] : memref<2x8x256xf32, #tpu.memory_space<vmem>>, vector<1x8x256xf32>
    %242 = vector.shape_cast %241 : vector<1x8x256xf32> to vector<8x256xf32>
    %243 = vector.shape_cast %240 : vector<8x256xf32> to vector<1x8x256xf32>
    tpu.vector_store %arg5[%c0_91, %c0_92, %c0_93], %243 {strides = array<i32>} : memref<2x8x256xf32, #tpu.memory_space<vmem>>, vector<1x8x256xf32>,
    %244 = vector.extract_strided_slice %239 {offsets = [0, 256], sizes = [8, 256], strides = [1, 1]} : vector<8x512xf32> to vector<8x256xf32>
    %c1 = arith.constant 1 : index
    %c0_94 = arith.constant 0 : index
    %c0_95 = arith.constant 0 : index
    %245 = vector.load %arg5[%c1, %c0_94, %c0_95] : memref<2x8x256xf32, #tpu.memory_space<vmem>>, vector<1x8x256xf32>
    %246 = vector.shape_cast %245 : vector<1x8x256xf32> to vector<8x256xf32>
    %247 = vector.shape_cast %244 : vector<8x256xf32> to vector<1x8x256xf32>
    tpu.vector_store %arg5[%c1, %c0_94, %c0_95], %247 {strides = array<i32>} : memref<2x8x256xf32, #tpu.memory_space<vmem>>, vector<1x8x256xf32>,
    return
  }
  func.func @transform_0(%arg0: i32) -> (i32, i32, i32) {
    %c0_i32 = arith.constant 0 : i32
    %c0_i32_0 = arith.constant 0 : i32
    %c0_i32_1 = arith.constant 0 : i32
    %c0_i32_2 = arith.constant 0 : i32
    return %c0_i32, %c0_i32_0, %c0_i32_1 : i32, i32, i32
  }
  func.func @transform_1(%arg0: i32) -> (i32, i32) {
    %c0_i32 = arith.constant 0 : i32
    %c0_i32_0 = arith.constant 0 : i32
    %c0_i32_1 = arith.constant 0 : i32
    return %c0_i32, %c0_i32_0 : i32, i32
  }
  func.func @transform_2(%arg0: i32) -> (i32, i32) {
    %c0_i32 = arith.constant 0 : i32
    %c0_i32_0 = arith.constant 0 : i32
    %c0_i32_1 = arith.constant 0 : i32
    return %c0_i32, %c0_i32_0 : i32, i32
  }
  func.func @transform_3(%arg0: i32) -> (i32, i32) {
    %c0_i32 = arith.constant 0 : i32
    %c0_i32_0 = arith.constant 0 : i32
    %c0_i32_1 = arith.constant 0 : i32
    return %c0_i32, %c0_i32_0 : i32, i32
  }
  func.func @transform_4(%arg0: i32) -> (i32, i32, i32) {
    %c0_i32 = arith.constant 0 : i32
    %c0_i32_0 = arith.constant 0 : i32
    %c0_i32_1 = arith.constant 0 : i32
    %c0_i32_2 = arith.constant 0 : i32
    return %c0_i32, %c0_i32_0, %c0_i32_1 : i32, i32, i32
  }
}

</mosaic_0001>

<bundles_post_ra>
// kernel: std_conv_forward.1
= control target key start
LH: loop header
LB: loop body
LE: loop exit
PB: predicated region body
PF: predicated region fallthrough
CT: control target
= control target key end

     0   :  { %vm26_vm0 = vcmask 1043456   ;;  %v648_v10 = vmov 839922192   ;;  %v44_v12 = vlaneseq  ;;  %v649_v33 = vmov 0   ;;  %s652_s22 = smov 127   ;;  %s653_s23 = smov 126   ;;  %s905_s0 = inlined_call_operand.vmem [shape: f32[2,4,256], index: 0, kind: input, shape index: {}]   ;;  %s906_s2 = inlined_call_operand.vmem [shape: f32[4,1], index: 2, kind: input, shape index: {}]   ;;  %s907_s1 = inlined_call_operand.vmem [shape: f32[4,1], index: 1, kind: input, shape index: {}]   ;;  %s908_s3 = inlined_call_operand.vmem [shape: bf16[8,36], index: 3, kind: input, shape index: {}]   ;;  %s909_s4 = inlined_call_operand.vmem [shape: f32[2,8,256], index: 4, kind: output, shape index: {}]  }
   0x1   :  { %v18_v0 = vld [vmem:[%s905_s0] sm:$0xff]  ;;  %v19_v1 = vld [vmem:[%s905_s0 + $0x8] sm:$0xff]  ;;  %v42_v11 = vunpack.c.l.s4 %v648_v10  ;;  %642 = vset.pattern.permute.xlu0 %v649_v33  ;;  %643 = vset.pattern.permute.xlu1 %v649_v33  ;;  %vm118_vm1 = vcmask 138240   ;;  %s654_s24 = smov 110   ;;  %s655_s25 = smov 95   ;;  %vm286_vm4 = vcmask 916480  }
   0x2   :  { %v22_v2 = vcombine.high %v18_v0, %v18_v0  ;;  %v27_v3 = vsel %vm26_vm0, %v18_v0, 0.0  ;;  %v23_v4 = vcombine.high %v19_v1, %v19_v1  ;;  %v32_v6 = vsel %vm26_vm0, %v19_v1, 0.0  ;;  %566 = vmatprep.mubr.bf16.mxu0 %v649_v33  ;;  %607 = vmatprep.mubr.bf16.mxu1 %v649_v33  ;;  %v89_v34 = vld [vmem:[%s906_s2] sm:$0xf]  ;;  %s650_s2 = smov 17   ;;  %s656_s26 = smov 96  }
   0x3   :  { %v43_v14 = vunpack.c.0.s8 %v42_v11  ;;  %v45_v15 = vshrl.u32 %v44_v12, 7  ;;  %v73_v40 = vld [vmem:[%s907_s1] sm:$0xf]  ;;  %v704_v55 = vand.u32 127, %v44_v12  ;;  %s651_s1 = smov 112   ;;  %s657_s27 = smov 111  }
   0x4   :  { %v28_v5 = vsel %vm26_vm0, %v22_v2, 0.0  ;;  %v33_v7 = vsel %vm26_vm0, %v23_v4, 0.0  ;;  %s658_s28 = smov 94   ;;  %vm204_vm5 = vcmask 1039360   ;;  %vm257_vm6 = vcmask 1031168  }
   0x5   :  { %v29_v8 = vadd.f32 %v28_v5, %v27_v3  ;;  %v34_v9 = vadd.f32 %v33_v7, %v32_v6  ;;  %v46_v17 = vsub.s32 %v43_v14, %v45_v15  ;;  %v138_v56 = vand.u32 15, %v704_v55 }
   0x6   :  { %v712_v58 = vadd.s32 128, %v704_v55  ;;  %vm356_vm9 = vcmask 900096   ;;  %vm426_vm10 = vcmask 777216   ;;  %vm397_vm11 = vcmask 785408  }
   0x7   :  { %30 = vadd.xlane.f32.xlu0 %v29_v8  ;;  %v709_v57 = vadd.s32 4294967295, %v138_v56  ;;  %vm327_vm12 = vcmask 908288   ;;  %vm467_vm13 = vcmask 769024   ;;  %vm521_vm14 = vcmask 1041408  }
   0x8   :  { %v145_v59 = vand.u32 15, %v712_v58  ;;  %vm517_vm15 = vcmask 293888  }
   0x9   :  { %vm160_vm2 = vcmp.ge.s32.totalorder %v709_v57, 0 }
   0xa   :  { %v722_v63 = vadd.s32 4294967295, %v145_v59 }
   0xb   :  { %35 = vadd.xlane.f32.xlu0 %v34_v9 }
   0xc   :  { %vm161_vm3 = vcmp.ge.s32.totalorder %v722_v63, 0 }
  0x94   :  { %v31_v13 = vpop.xlane.xlu0 %30 }
  0x98   :  { %v36_v16 = vpop.xlane.xlu0 %35 }
  0x99   :  { %v37_v18 = vadd.f32 %v36_v16, %v31_v13 }
  0x9b   :  { %v39_v19 = vmul.f32 0.001953125, %v37_v18 }
  0x9d   :  { %v47_v20 = vrot.slane %v39_v19, %v46_v17 }
  0x9f   :  { %v50_v21 = vsub.f32 %v19_v1, %v47_v20  ;;  %v49_v22 = vsub.f32 %v18_v0, %v47_v20 }
  0xa1   :  { %v51_v23 = vmul.f32 %v49_v22, %v49_v22  ;;  %v52_v24 = vmul.f32 %v50_v21, %v50_v21 }
  0xa3   :  { %v55_v25 = vcombine.high %v51_v23, %v51_v23  ;;  %v56_v26 = vcombine.high %v52_v24, %v52_v24  ;;  %v59_v27 = vsel %vm26_vm0, %v51_v23, 0.0  ;;  %v64_v31 = vsel %vm26_vm0, %v52_v24, 0.0 }
  0xa5   :  { %v60_v28 = vsel %vm26_vm0, %v55_v25, 0.0  ;;  %v65_v30 = vsel %vm26_vm0, %v56_v26, 0.0 }
  0xa6   :  { %v61_v29 = vadd.f32 %v60_v28, %v59_v27  ;;  %v66_v32 = vadd.f32 %v65_v30, %v64_v31 }
  0xa8   :  { %62 = vadd.xlane.f32.xlu1 %v61_v29 }
  0xac   :  { %67 = vadd.xlane.f32.xlu1 %v66_v32 }
  0xbd   :  { %92 = vperm.xlu1 %643, %v89_v34  }
 0x135   :  { %v63_v35 = vpop.xlane.xlu1 %62 }
 0x139   :  { %v68_v36 = vpop.xlane.xlu1 %67 }
 0x13a   :  { %v69_v37 = vadd.f32 %v68_v36, %v63_v35 }
 0x13c   :  { %v70_v38 = vmul.f32 0.001953125, %v69_v37 }
 0x13d   :  { %v93_v43 = vpop.permute.xlu1 %92 }
 0x13e   :  { %v71_v39 = vadd.f32 1e-05, %v70_v38  ;;  %v100_v46 = vrot.slane %v93_v43, %v46_v17 }
 0x140   :  { %646 = vrsqrt.f32 %v71_v39 }
 0x14a   :  { %v647_v41 = vpop.eup %646 }
 0x14b   :  { %v74_v42 = vmul.f32 %v647_v41, %v73_v40 }
 0x14d   :  { %77 = vperm.xlu0 %642, %v74_v42  }
 0x1cc   :  { %v78_v44 = vpop.permute.xlu0 %77 }
 0x1cd   :  { %v85_v45 = vrot.slane %v78_v44, %v46_v17 }
 0x1cf   :  { %v87_v47 = vmul.f32 %v85_v45, %v49_v22  ;;  %v88_v48 = vmul.f32 %v85_v45, %v50_v21 }
 0x1d1   :  { %v102_v49 = vadd.f32 %v100_v46, %v87_v47  ;;  %v103_v50 = vadd.f32 %v100_v46, %v88_v48 }
 0x1d3   :  { %v104_v51 = vmax.f32 %v102_v49, 0.0  ;;  %v105_v52 = vmax.f32 %v103_v50, 0.0  ;;  %v821_v50 = vadd.s32 1, %v138_v56 }
 0x1d5   :  { %110 = vrot.lane.b32.xlu1 %v104_v51, %s650_s2  ;;  %v108_v53 = vcombine.high %v104_v51, %v104_v51  ;;  %v109_v54 = vcombine.high %v105_v52, %v105_v52  ;;  %v825_v51 = vadd.s32 1, %v145_v59  ;;  %vm237_vm7 = vcmp.lt.s32.totalorder %v821_v50, 16  ;;  %v516_v50 = vld [vmem:[%s908_s3] sm:$0xf] }
 0x1d7   :  { %vm238_vm8 = vcmp.lt.s32.totalorder %v825_v51, 16 }
 0x1d9   :  { %114 = vrot.lane.b32.xlu1 %v105_v52, %s650_s2 }
 0x1dd   :  { %112 = vrot.lane.b32.xlu1 %v108_v53, %s650_s2 }
 0x1e1   :  { %116 = vrot.lane.b32.xlu1 %v109_v54, %s650_s2 }
 0x247   :  { %v111_v60 = vpop.permute.xlu1 %110 }
 0x248   :  { %v127_v61 = vsel %vm118_vm1, 0.0, %v111_v60 }
 0x249   :  { %274 = vrot.lane.b32.xlu1 %v127_v61, %s651_s1  ;;  %v170_v62 = vsel %vm160_vm2, %v127_v61, 0.0 }
 0x24a   :  { %174 = vst [vmem:[#allocation2] sm:$0xf] %v170_v62 }
 0x24b   :  { %v115_v0 = vpop.permute.xlu1 %114 }
 0x24c   :  { %v128_v1 = vsel %vm118_vm1, 0.0, %v115_v0 }
 0x24d   :  { %280 = vrot.lane.b32.xlu0 %v128_v1, %s651_s1  ;;  %192 = vrot.lane.b32.xlu1 %v127_v61, %s652_s22  ;;  %v172_v2 = vsel %vm160_vm2, %v128_v1, 0.0 }
 0x24e   :  { %176 = vst [vmem:[#allocation2 + $0x10] sm:$0xf] %v172_v2 }
 0x24f   :  { %v113_v3 = vpop.permute.xlu1 %112 }
 0x250   :  { %v119_v4 = vsel %vm118_vm1, %v111_v60, %v113_v3  ;;  %v129_v9 = vsel %vm118_vm1, %v113_v3, 0.0 }
 0x251   :  { %198 = vrot.lane.b32.xlu0 %v128_v1, %s652_s22  ;;  %245 = vrot.lane.b32.xlu1 %v127_v61, %s653_s23  ;;  %v171_v5 = vsel %vm161_vm3, %v119_v4, 0.0 }
 0x252   :  { %175 = vst [vmem:[#allocation2 + $0x8] sm:$0xf] %v171_v5 }
 0x253   :  { %v117_v6 = vpop.permute.xlu1 %116 }
 0x254   :  { %v120_v7 = vsel %vm118_vm1, %v115_v0, %v117_v6  ;;  %v130_v10 = vsel %vm118_vm1, %v117_v6, 0.0 }
 0x255   :  { %251 = vrot.lane.b32.xlu0 %v128_v1, %s653_s23  ;;  %344 = vrot.lane.b32.xlu1 %v127_v61, %s654_s24  ;;  %v173_v8 = vsel %vm161_vm3, %v120_v7, 0.0 }
 0x256   :  { %177 = vst [vmem:[#allocation2 + $0x18] sm:$0xf] %v173_v8 }
 0x259   :  { %350 = vrot.lane.b32.xlu0 %v128_v1, %s654_s24  ;;  %414 = vrot.lane.b32.xlu1 %v127_v61, %s655_s25 }
 0x25d   :  { %420 = vrot.lane.b32.xlu0 %v128_v1, %s655_s25  ;;  %385 = vrot.lane.b32.xlu1 %v127_v61, %s656_s26 }
 0x261   :  { %391 = vrot.lane.b32.xlu0 %v128_v1, %s656_s26  ;;  %315 = vrot.lane.b32.xlu1 %v127_v61, %s657_s27 }
 0x265   :  { %321 = vrot.lane.b32.xlu0 %v128_v1, %s657_s27  ;;  %455 = vrot.lane.b32.xlu1 %v127_v61, %s658_s28 }
 0x269   :  { %461 = vrot.lane.b32.xlu0 %v128_v1, %s658_s28  ;;  %276 = vrot.lane.b32.xlu1 %v119_v4, %s651_s1 }
 0x26d   :  { %278 = vrot.lane.b32.xlu1 %v129_v9, %s651_s1  ;;  %284 = vrot.lane.b32.xlu0 %v130_v10, %s651_s1 }
 0x271   :  { %196 = vrot.lane.b32.xlu0 %v129_v9, %s652_s22  ;;  %282 = vrot.lane.b32.xlu1 %v120_v7, %s651_s1 }
 0x275   :  { %202 = vrot.lane.b32.xlu0 %v130_v10, %s652_s22  ;;  %194 = vrot.lane.b32.xlu1 %v119_v4, %s652_s22 }
 0x279   :  { %249 = vrot.lane.b32.xlu0 %v129_v9, %s653_s23  ;;  %200 = vrot.lane.b32.xlu1 %v120_v7, %s652_s22 }
 0x27d   :  { %255 = vrot.lane.b32.xlu0 %v130_v10, %s653_s23  ;;  %247 = vrot.lane.b32.xlu1 %v119_v4, %s653_s23 }
 0x281   :  { %348 = vrot.lane.b32.xlu0 %v129_v9, %s654_s24  ;;  %253 = vrot.lane.b32.xlu1 %v120_v7, %s653_s23 }
 0x285   :  { %354 = vrot.lane.b32.xlu0 %v130_v10, %s654_s24  ;;  %346 = vrot.lane.b32.xlu1 %v119_v4, %s654_s24 }
 0x289   :  { %418 = vrot.lane.b32.xlu0 %v129_v9, %s655_s25  ;;  %352 = vrot.lane.b32.xlu1 %v120_v7, %s654_s24 }
 0x28d   :  { %424 = vrot.lane.b32.xlu0 %v130_v10, %s655_s25  ;;  %416 = vrot.lane.b32.xlu1 %v119_v4, %s655_s25 }
 0x291   :  { %389 = vrot.lane.b32.xlu0 %v129_v9, %s656_s26  ;;  %422 = vrot.lane.b32.xlu1 %v120_v7, %s655_s25 }
 0x295   :  { %395 = vrot.lane.b32.xlu0 %v130_v10, %s656_s26  ;;  %387 = vrot.lane.b32.xlu1 %v119_v4, %s656_s26 }
 0x299   :  { %319 = vrot.lane.b32.xlu0 %v129_v9, %s657_s27  ;;  %393 = vrot.lane.b32.xlu1 %v120_v7, %s656_s26 }
 0x29d   :  { %325 = vrot.lane.b32.xlu0 %v130_v10, %s657_s27  ;;  %317 = vrot.lane.b32.xlu1 %v119_v4, %s657_s27 }
 0x2a1   :  { %457 = vrot.lane.b32.xlu0 %v119_v4, %s658_s28  ;;  %323 = vrot.lane.b32.xlu1 %v120_v7, %s657_s27 }
 0x2a5   :  { %465 = vrot.lane.b32.xlu0 %v130_v10, %s658_s28  ;;  %459 = vrot.lane.b32.xlu1 %v129_v9, %s658_s28 }
 0x2a9   :  { %463 = vrot.lane.b32.xlu1 %v120_v7, %s658_s28 }
 0x2bb   :  { %v275_v11 = vpop.permute.xlu1 %274 }
 0x2bf   :  { %v281_v12 = vpop.permute.xlu0 %280  ;;  %v193_v13 = vpop.permute.xlu1 %192 }
 0x2c3   :  { %v199_v14 = vpop.permute.xlu0 %198  ;;  %v246_v15 = vpop.permute.xlu1 %245 }
 0x2c7   :  { %v783_v16 = vpop.permute.xlu0 %251  ;;  %v785_v17 = vpop.permute.xlu1 %344 }
 0x2cb   :  { %v787_v18 = vpop.permute.xlu0 %350  ;;  %v789_v19 = vpop.permute.xlu1 %414 }
 0x2cf   :  { %v791_v20 = vpop.permute.xlu0 %420  ;;  %v793_v21 = vpop.permute.xlu1 %385 }
 0x2d3   :  { %v795_v22 = vpop.permute.xlu0 %391  ;;  %v797_v23 = vpop.permute.xlu1 %315 }
 0x2d7   :  { %v799_v24 = vpop.permute.xlu0 %321  ;;  %v801_v25 = vpop.permute.xlu1 %455 }
 0x2db   :  { %v803_v26 = vpop.permute.xlu0 %461  ;;  %v277_v27 = vpop.permute.xlu1 %276 }
 0x2dc   :  { %v287_v28 = vsel %vm286_vm4, %v275_v11, %v277_v27 }
 0x2dd   :  { %v295_v29 = vsel %vm160_vm2, %v287_v28, 0.0 }
 0x2de   :  { %v301_v30 = vrot.slane %v295_v29, 4 }
 0x2df   :  { %v285_v31 = vpop.permute.xlu0 %284  ;;  %v279_v32 = vpop.permute.xlu1 %278 }
 0x2e0   :  { %305 = vst [vmem:[#allocation2 + $0x20] sm:$0xf0] %v301_v30  ;;  %v288_v33 = vsel %vm286_vm4, %v277_v27, %v279_v32 }
 0x2e1   :  { %v296_v34 = vsel %vm161_vm3, %v288_v33, 0.0 }
 0x2e2   :  { %v302_v35 = vrot.slane %v296_v34, 4 }
 0x2e3   :  { %v197_v36 = vpop.permute.xlu0 %196  ;;  %v283_v37 = vpop.permute.xlu1 %282 }
 0x2e4   :  { %306 = vst [vmem:[#allocation2 + $0x28] sm:$0xf0] %v302_v35  ;;  %v289_v38 = vsel %vm286_vm4, %v281_v12, %v283_v37  ;;  %v290_v39 = vsel %vm286_vm4, %v283_v37, %v285_v31 }
 0x2e5   :  { %v297_v40 = vsel %vm160_vm2, %v289_v38, 0.0  ;;  %v298_v41 = vsel %vm161_vm3, %v290_v39, 0.0 }
 0x2e6   :  { %v309_v42 = vrot.slane %v297_v40, 4  ;;  %v310_v43 = vrot.slane %v298_v41, 4 }
 0x2e7   :  { %v203_v44 = vpop.permute.xlu0 %202  ;;  %v195_v45 = vpop.permute.xlu1 %194 }
 0x2e8   :  { %313 = vst [vmem:[#allocation2 + $0x30] sm:$0xf0] %v309_v42  ;;  %314 = vst [vmem:[#allocation2 + $0x38] sm:$0xf0] %v310_v43  ;;  %v205_v46 = vsel %vm204_vm5, %v193_v13, %v195_v45  ;;  %v206_v47 = vsel %vm204_vm5, %v195_v45, %v197_v36 }
 0x2e9   :  { %v219_v48 = vrot.slane %v205_v46, 4  ;;  %v220_v49 = vrot.slane %v206_v47, 4 }
 0x2eb   :  { %223 = vst [vmem:[#allocation2] sm:$0xf0] %v219_v48  ;;  %224 = vst [vmem:[#allocation2 + $0x8] sm:$0xf0] %v220_v49  ;;  %v250_v52 = vpop.permute.xlu0 %249  ;;  %v201_v53 = vpop.permute.xlu1 %200 }
 0x2ec   :  { %v207_v54 = vsel %vm204_vm5, %v199_v14, %v201_v53  ;;  %v208_v60 = vsel %vm204_vm5, %v201_v53, %v203_v44 }
 0x2ed   :  { %v227_v61 = vrot.slane %v207_v54, 4  ;;  %v228_v62 = vrot.slane %v208_v60, 4 }
 0x2ef   :  { %231 = vst [vmem:[#allocation2 + $0x10] sm:$0xf0] %v227_v61  ;;  %232 = vst [vmem:[#allocation2 + $0x18] sm:$0xf0] %v228_v62  ;;  %v256_v55 = vpop.permute.xlu0 %255  ;;  %v248_v56 = vpop.permute.xlu1 %247 }
 0x2f0   :  { %v258_v58 = vsel %vm257_vm6, %v246_v15, %v248_v56  ;;  %v259_v59 = vsel %vm257_vm6, %v248_v56, %v250_v52 }
 0x2f1   :  { %v266_v0 = vsel %vm237_vm7, %v258_v58, 0.0  ;;  %v267_v1 = vsel %vm238_vm8, %v259_v59, 0.0 }
 0x2f2   :  { %270 = vst [vmem:[#allocation2 + $0x20] sm:$0xf] %v266_v0  ;;  %271 = vst [vmem:[#allocation2 + $0x28] sm:$0xf] %v267_v1  ;;  %v485_v12 = vld [vmem:[#allocation2 + $0x8] sm:$0xff] }
 0x2f3   :  { %v349_v2 = vpop.permute.xlu0 %348  ;;  %v254_v3 = vpop.permute.xlu1 %253 }
 0x2f4   :  { %v260_v4 = vsel %vm257_vm6, %v783_v16, %v254_v3  ;;  %v261_v5 = vsel %vm257_vm6, %v254_v3, %v256_v55  ;;  %v484_v16 = vld [vmem:[#allocation2] sm:$0xff] }
 0x2f5   :  { %v268_v6 = vsel %vm237_vm7, %v260_v4, 0.0  ;;  %v269_v7 = vsel %vm238_vm8, %v261_v5, 0.0 }
 0x2f6   :  { %272 = vst [vmem:[#allocation2 + $0x30] sm:$0xf] %v268_v6  ;;  %273 = vst [vmem:[#allocation2 + $0x38] sm:$0xf] %v269_v7  ;;  %v487_v35 = vld [vmem:[#allocation2 + $0x18] sm:$0xff]  ;;  %v486_v39 = vld [vmem:[#allocation2 + $0x10] sm:$0xff] }
 0x2f7   :  { %v355_v8 = vpop.permute.xlu0 %354  ;;  %v347_v9 = vpop.permute.xlu1 %346 }
 0x2f8   :  { %v357_v10 = vsel %vm356_vm9, %v785_v17, %v347_v9  ;;  %v358_v11 = vsel %vm356_vm9, %v347_v9, %v349_v2 }
 0x2f9   :  { %v365_v13 = vsel %vm237_vm7, %v357_v10, 0.0  ;;  %v366_v14 = vsel %vm238_vm8, %v358_v11, 0.0  ;;  %v489_v15 = vld [vmem:[#allocation2 + $0x28] sm:$0xff]  ;;  %v488_v27 = vld [vmem:[#allocation2 + $0x20] sm:$0xff] }
 0x2fa   :  { %v371_v28 = vrot.slane %v365_v13, 4  ;;  %v372_v29 = vrot.slane %v366_v14, 4  ;;  %v505_v30 = vpack.c.bf16 %v489_v15, %v485_v12  ;;  %v504_v31 = vpack.c.bf16 %v488_v27, %v484_v16 }
 0x2fb   :  { %v419_v32 = vpop.permute.xlu0 %418  ;;  %v353_v33 = vpop.permute.xlu1 %352 }
 0x2fc   :  { %375 = vst [vmem:[#allocation2 + $0x40] sm:$0xf0] %v371_v28  ;;  %376 = vst [vmem:[#allocation2 + $0x48] sm:$0xf0] %v372_v29  ;;  %v359_v17 = vsel %vm356_vm9, %v787_v18, %v353_v33  ;;  %v360_v34 = vsel %vm356_vm9, %v353_v33, %v355_v8  ;;  %534 = vmatprep.subr.bf16.mxu0 %v505_v30 }
 0x2fd   :  { %v367_v36 = vsel %vm237_vm7, %v359_v17, 0.0  ;;  %v368_v37 = vsel %vm238_vm8, %v360_v34, 0.0  ;;  %535 = vmatpush1.bf16.msra.mxu0 %v504_v31  ;;  %v491_v38 = vld [vmem:[#allocation2 + $0x38] sm:$0xff]  ;;  %v490_v40 = vld [vmem:[#allocation2 + $0x30] sm:$0xff] }
 0x2fe   :  { %v379_v41 = vrot.slane %v367_v36, 4  ;;  %v380_v42 = vrot.slane %v368_v37, 4  ;;  %v507_v43 = vpack.c.bf16 %v491_v38, %v487_v35  ;;  %v506_v44 = vpack.c.bf16 %v490_v40, %v486_v39 }
 0x2ff   :  { %v425_v18 = vpop.permute.xlu0 %424  ;;  %v417_v45 = vpop.permute.xlu1 %416 }
 0x300   :  { %383 = vst [vmem:[#allocation2 + $0x50] sm:$0xf0] %v379_v41  ;;  %384 = vst [vmem:[#allocation2 + $0x58] sm:$0xf0] %v380_v42  ;;  %v427_v46 = vsel %vm426_vm10, %v789_v19, %v417_v45  ;;  %v428_v47 = vsel %vm426_vm10, %v417_v45, %v419_v32  ;;  %575 = vmatprep.subr.bf16.mxu1 %v507_v43 }
 0x301   :  { %v441_v48 = vrot.slane %v427_v46, 4  ;;  %v442_v49 = vrot.slane %v428_v47, 4  ;;  %576 = vmatpush1.bf16.msra.mxu1 %v506_v44 }
 0x303   :  { %445 = vst [vmem:[#allocation2 + $0x60] sm:$0xf0] %v441_v48  ;;  %446 = vst [vmem:[#allocation2 + $0x68] sm:$0xf0] %v442_v49  ;;  %v390_v52 = vpop.permute.xlu0 %389  ;;  %v423_v53 = vpop.permute.xlu1 %422 }
 0x304   :  { %v429_v54 = vsel %vm426_vm10, %v791_v20, %v423_v53  ;;  %v430_v60 = vsel %vm426_vm10, %v423_v53, %v425_v18 }
 0x305   :  { %v449_v61 = vrot.slane %v429_v54, 4  ;;  %v450_v62 = vrot.slane %v430_v60, 4 }
 0x307   :  { %453 = vst [vmem:[#allocation2 + $0x70] sm:$0xf0] %v449_v61  ;;  %454 = vst [vmem:[#allocation2 + $0x78] sm:$0xf0] %v450_v62  ;;  %v396_v19 = vpop.permute.xlu0 %395  ;;  %v388_v55 = vpop.permute.xlu1 %387 }
 0x308   :  { %v398_v56 = vsel %vm397_vm11, %v793_v21, %v388_v55  ;;  %v399_v58 = vsel %vm397_vm11, %v388_v55, %v390_v52 }
 0x309   :  { %v406_v59 = vsel %vm160_vm2, %v398_v56, 0.0  ;;  %v407_v0 = vsel %vm161_vm3, %v399_v58, 0.0 }
 0x30a   :  { %410 = vst [vmem:[#allocation2 + $0x60] sm:$0xf] %v406_v59  ;;  %411 = vst [vmem:[#allocation2 + $0x68] sm:$0xf] %v407_v0 }
 0x30b   :  { %v320_v20 = vpop.permute.xlu0 %319  ;;  %v394_v1 = vpop.permute.xlu1 %393 }
 0x30c   :  { %v400_v2 = vsel %vm397_vm11, %v795_v22, %v394_v1  ;;  %v401_v3 = vsel %vm397_vm11, %v394_v1, %v396_v19 }
 0x30d   :  { %v408_v4 = vsel %vm160_vm2, %v400_v2, 0.0  ;;  %v409_v21 = vsel %vm161_vm3, %v401_v3, 0.0 }
 0x30e   :  { %412 = vst [vmem:[#allocation2 + $0x70] sm:$0xf] %v408_v4  ;;  %413 = vst [vmem:[#allocation2 + $0x78] sm:$0xf] %v409_v21 }
 0x30f   :  { %v326_v5 = vpop.permute.xlu0 %325  ;;  %v318_v6 = vpop.permute.xlu1 %317 }
 0x310   :  { %v328_v7 = vsel %vm327_vm12, %v797_v23, %v318_v6  ;;  %v329_v8 = vsel %vm327_vm12, %v318_v6, %v320_v20 }
 0x311   :  { %340 = vst [vmem:[#allocation2 + $0x40] sm:$0xf] %v328_v7  ;;  %341 = vst [vmem:[#allocation2 + $0x48] sm:$0xf] %v329_v8  ;;  %v497_v23 = vld [vmem:[#allocation2 + $0x68] sm:$0xff]  ;;  %v496_v16 = vld [vmem:[#allocation2 + $0x60] sm:$0xff] }
 0x313   :  { %v458_v9 = vpop.permute.xlu0 %457  ;;  %v324_v22 = vpop.permute.xlu1 %323 }
 0x314   :  { %v468_v57 = vsel %vm467_vm13, %v801_v25, %v458_v9  ;;  %v330_v10 = vsel %vm327_vm12, %v799_v24, %v324_v22  ;;  %v331_v63 = vsel %vm327_vm12, %v324_v22, %v326_v5 }
 0x315   :  { %v476_v11 = vsel %vm237_vm7, %v468_v57, 0.0  ;;  %342 = vst [vmem:[#allocation2 + $0x50] sm:$0xf] %v330_v10  ;;  %343 = vst [vmem:[#allocation2 + $0x58] sm:$0xf] %v331_v63  ;;  %v499_v30 = vld [vmem:[#allocation2 + $0x78] sm:$0xff] }
 0x316   :  { %480 = vst [vmem:[#allocation2 + $0x80] sm:$0xf] %v476_v11  ;;  %v498_v34 = vld [vmem:[#allocation2 + $0x70] sm:$0xff] }
 0x317   :  { %v460_v12 = vpop.permute.xlu1 %459  ;;  %v466_v24 = vpop.permute.xlu0 %465 }
 0x318   :  { %v469_v13 = vsel %vm467_vm13, %v458_v9, %v460_v12  ;;  %v493_v14 = vld [vmem:[#allocation2 + $0x48] sm:$0xff]  ;;  %v492_v15 = vld [vmem:[#allocation2 + $0x40] sm:$0xff] }
 0x319   :  { %v477_v27 = vsel %vm238_vm8, %v469_v13, 0.0  ;;  %v509_v25 = vpack.c.bf16 %v497_v23, %v493_v14  ;;  %v508_v28 = vpack.c.bf16 %v496_v16, %v492_v15 }
 0x31a   :  { %481 = vst [vmem:[#allocation2 + $0x88] sm:$0xf] %v477_v27 }
 0x31b   :  { %536 = vmatprep.subr.bf16.mxu0 %v509_v25  ;;  %v464_v29 = vpop.permute.xlu1 %463 }
 0x31c   :  { %v470_v31 = vsel %vm467_vm13, %v803_v26, %v464_v29  ;;  %v471_v32 = vsel %vm467_vm13, %v464_v29, %v466_v24  ;;  %537 = vmatpush1.bf16.msra.mxu0 %v508_v28  ;;  %v495_v33 = vld [vmem:[#allocation2 + $0x58] sm:$0xff]  ;;  %v494_v17 = vld [vmem:[#allocation2 + $0x50] sm:$0xff] }
 0x31d   :  { %v478_v35 = vsel %vm237_vm7, %v470_v31, 0.0  ;;  %v479_v36 = vsel %vm238_vm8, %v471_v32, 0.0  ;;  %v511_v37 = vpack.c.bf16 %v499_v30, %v495_v33  ;;  %v510_v38 = vpack.c.bf16 %v498_v34, %v494_v17  ;;  %v500_v39 = vld [vmem:[#allocation2 + $0x80] sm:$0xf] }
 0x31e   :  { %482 = vst [vmem:[#allocation2 + $0x90] sm:$0xf] %v478_v35  ;;  %483 = vst [vmem:[#allocation2 + $0x98] sm:$0xf] %v479_v36  ;;  %v512_v26 = vpack.c.bf16 %v500_v39, %v500_v39 }
 0x31f   :  { %577 = vmatprep.subr.bf16.mxu1 %v511_v37 }
 0x320   :  { %578 = vmatpush1.bf16.msra.mxu1 %v510_v38  ;;  %v523_v42 = vsel %vm521_vm14, %v512_v26, 0 }
 0x321   :  { %v501_v40 = vld [vmem:[#allocation2 + $0x88] sm:$0xf] }
 0x322   :  { %v513_v41 = vpack.c.bf16 %v501_v40, %v501_v40 }
 0x324   :  { %625 = vmatprep.subr.msk.bf16.mxu0 %vm521_vm14, %v513_v41 }
 0x325   :  { %539 = vmatpush1.bf16.msra.mxu0 %v523_v42  ;;  %v503_v51 = vld [vmem:[#allocation2 + $0x98] sm:$0xf]  ;;  %v502_v43 = vld [vmem:[#allocation2 + $0x90] sm:$0xf] }
 0x326   :  { %v515_v44 = vpack.c.bf16 %v503_v51, %v503_v51  ;;  %v514_v18 = vpack.c.bf16 %v502_v43, %v502_v43 }
 0x328   :  { %627 = vmatprep.subr.msk.bf16.mxu1 %vm521_vm14, %v515_v44  ;;  %626 = vmatmul.mubr.msk.bf16.vlgmr.msra.gmra.mrb[0].mxu0 %vm517_vm15, %v516_v50  ;;  %v529_v45 = vsel %vm521_vm14, %v514_v18, 0 }
 0x329   :  { %580 = vmatpush1.bf16.msra.mxu1 %v529_v45 }
 0x32c   :  { %628 = vmatmul.mubr.msk.bf16.vlgmr.msra.gmra.mrb[0].mxu1 %vm517_vm15, %v516_v50 }
 0x3fb   :  { %v568_v46 = vpop.f32.mrb[0].mxu0 }
 0x3fc   :  { %616 = vst [vmem:[%s909_s4] sm:$0xff] %v568_v46  ;;  %v570_v47 = vpop.f32.mrb[1].mxu0 }
 0x3fd   :  { %617 = vst [vmem:[%s909_s4 + $0x8] sm:$0xff] %v570_v47  ;;  %v572_v48 = vpop.f32.mrb[2].mxu0 }
 0x3fe   :  { %v573_v49 = vpop.f32.mrb[3].mxu0 }
 0x3ff   :  { %v609_v52 = vpop.f32.mrb[0].mxu1 }
 0x400   :  { %629 = vst [vmem:[%s909_s4 + $0x10] sm:$0xff] %v609_v52  ;;  %v611_v53 = vpop.f32.mrb[1].mxu1 }
 0x401   :  { %630 = vst [vmem:[%s909_s4 + $0x18] sm:$0xff] %v611_v53  ;;  %v613_v54 = vpop.f32.mrb[2].mxu1 }
 0x402   :  { %v614_v60 = vpop.f32.mrb[3].mxu1 }

</bundles_post_ra>
